<compile_context>
chip_gen: v7x
topology: tpu7x:2x2x1
jax: 0.10.0
libtpu: 0.0.40
codegen_flags: <defaults>
</compile_context>

<pallas_src>
import functools
import math

import jax
import jax.numpy as jnp
from jax import lax
from jax.experimental import pallas as pl
from jax.experimental.pallas import tpu as pltpu

BN_EPS = 1e-5
NEG_SLOPE = 0.1

_LANE = 128
_SUBLANE = 8
_VMEM_LIMIT = 32 * 1024 * 1024     # explicit scoped-VMEM limit, safe on v5e/v6e/v7x
_VMEM_BUDGET = 20 * 1024 * 1024    # target double-buffered working set


def _round_up(x, m):
    return (x + m - 1) // m * m


# ---------------------------------------------------------------------------
# Phase 1: 3x3/stride-2 conv as 9 accumulated MXU matmuls over decimated
# input phases, plus per-tile partial BN statistics (sum / sum-of-squares).
# ---------------------------------------------------------------------------
def _conv_stats_kernel(ec0, ec1, ec2, oc0, oc1, oc2, w_ref, y_ref, stats_ref):
    tr, wo, cin = oc0.shape          # (row tile, Wo, Cin)
    tm, cp = y_ref.shape             # tm == tr * wo, cp == lane-padded Cout
    ecs = (ec0, ec1, ec2)            # even input columns, row shift ky = 0,1,2
    ocs = (oc0, oc1, oc2)            # odd  input columns, row shift ky = 0,1,2

    acc = jnp.zeros((tm, cp), jnp.float32)
    for ky in range(3):
        # kx == 0 / 2 read the even-column phase at column offsets 0 / +1,
        # kx == 1 reads the odd-column phase.  All 9 taps accumulate in f32.
        acc += jnp.dot(ecs[ky][:, 0:wo, :].reshape(tm, cin), w_ref[3 * ky + 0],
                       preferred_element_type=jnp.float32)
        acc += jnp.dot(ocs[ky][...].reshape(tm, cin), w_ref[3 * ky + 1],
                       preferred_element_type=jnp.float32)
        acc += jnp.dot(ecs[ky][:, 1:wo + 1, :].reshape(tm, cin), w_ref[3 * ky + 2],
                       preferred_element_type=jnp.float32)

    y_ref[...] = acc.astype(y_ref.dtype)

    # Per-tile partial statistics: sublane 0 = sum, sublane 1 = sum of squares.
    srows = stats_ref.shape[1]
    tsum = jnp.sum(acc, axis=0)
    tssq = jnp.sum(acc * acc, axis=0)
    row = lax.broadcasted_iota(jnp.int32, (1, srows, cp), 1)
    stats_ref[...] = jnp.where(row == 0, tsum[None, None, :],
                               jnp.where(row == 1, tssq[None, None, :], 0.0))


# ---------------------------------------------------------------------------
# Phase 2: folded BatchNorm (scale/shift) + LeakyReLU(0.1), fully elementwise.
# ---------------------------------------------------------------------------
def _bn_lrelu_kernel(y_ref, scale_ref, shift_ref, o_ref):
    z = y_ref[...] * scale_ref[...] + shift_ref[...]
    o_ref[...] = jnp.maximum(z, NEG_SLOPE * z).astype(o_ref.dtype)


def _pick_row_tile(n_rows, wo, cin, cp, itemsize, sub):
    """Pick a row tile: ~2048 matmul rows per step, bounded by the VMEM budget."""
    tile_r = max(sub, (2048 // max(wo, 1)) // sub * sub)
    tile_r = min(tile_r, _round_up(n_rows, sub))

    def vmem_est(tr):
        ins = 6 * tr * (wo + 1) * cin * itemsize
        wts = 9 * cin * cp * itemsize
        outs = tr * wo * cp * 4 + _SUBLANE * cp * 4
        return 2 * (ins + wts + outs)          # 2x: double-buffered pipeline

    while tile_r > sub and vmem_est(tile_r) > _VMEM_BUDGET:
        tile_r -= sub
    return max(tile_r, sub)


@functools.partial(jax.jit,
                   static_argnames=("compute_dtype", "row_tile", "out_layout"))
def downsample_layer(x_nchw, w_oihw, conv_b, bn_gamma, bn_beta, *,
                     compute_dtype=jnp.bfloat16, row_tile=None,
                     out_layout="NCHW"):
    """x_nchw: (N, Cin, H, W) -> (N, Cout, Ho, Wo) (or NHWC with out_layout)."""
    N, Cin, H, W = x_nchw.shape
    Cout = w_oihw.shape[0]
    Ho = (H + 2 - 3) // 2 + 1
    Wo = (W + 2 - 3) // 2 + 1
    Cp = _round_up(Cout, _LANE)              # lane-dense output channels
    R = N * Ho                               # flattened (batch, out-row) count
    M = N * Ho * Wo                          # true pixel count for BN stats

    # Conv bias is mathematically cancelled by the training-mode BN mean
    # subtraction, so it is dropped from the fused math.
    del conv_b

    # ---- glue: NCHW -> NHWC, spatial pad, six decimated phase tensors ------
    x = jnp.transpose(x_nchw, (0, 2, 3, 1)).astype(compute_dtype)
    xp = jnp.pad(x, ((0, 0), (1, 1), (1, 1), (0, 0)))       # (N, H+2, W+2, Cin)
    ecs, ocs = [], []
    for ky in range(3):
        rows = xp[:, ky:ky + 2 * Ho:2]                       # (N, Ho, W+2, Cin)
        ecs.append(rows[:, :, 0:2 * Wo + 1:2, :].reshape(R, Wo + 1, Cin))
        ocs.append(rows[:, :, 1:2 * Wo:2, :].reshape(R, Wo, Cin))

    # ---- tile the M axis ----------------------------------------------------
    sub = _SUBLANE // math.gcd(Wo, _SUBLANE)     # keeps (tile_r * Wo) % 8 == 0
    itemsize = jnp.dtype(compute_dtype).itemsize
    if row_tile is None:
        tile_r = _pick_row_tile(R, Wo, Cin, Cp, itemsize, sub)
    else:
        tile_r = _round_up(max(1, int(row_tile)), sub)
    r_pad = _round_up(R, tile_r)
    if r_pad > R:                                # ragged edge -> zero rows
        pad = ((0, r_pad - R), (0, 0), (0, 0))
        ecs = [jnp.pad(t, pad) for t in ecs]
        ocs = [jnp.pad(t, pad) for t in ocs]
    n_tiles = r_pad // tile_r
    tile_m = tile_r * Wo
    m_pad = r_pad * Wo

    # conv weights: OIHW -> (ky*3+kx, Cin, Cp), zero-padded output channels.
    w_taps = jnp.transpose(w_oihw, (2, 3, 1, 0)).reshape(9, Cin, Cout)
    w_taps = jnp.pad(w_taps, ((0, 0), (0, 0), (0, Cp - Cout))).astype(compute_dtype)

    cparams = pltpu.CompilerParams(dimension_semantics=("parallel",),
                                   vmem_limit_bytes=_VMEM_LIMIT)

    # ---- phase 1: conv + partial stats --------------------------------------
    y, stats = pl.pallas_call(
        _conv_stats_kernel,
        out_shape=(jax.ShapeDtypeStruct((m_pad, Cp), jnp.float32),
                   jax.ShapeDtypeStruct((n_tiles, _SUBLANE, Cp), jnp.float32)),
        grid=(n_tiles,),
        in_specs=[pl.BlockSpec((tile_r, Wo + 1, Cin), lambda i: (i, 0, 0))] * 3
               + [pl.BlockSpec((tile_r, Wo, Cin), lambda i: (i, 0, 0))] * 3
               + [pl.BlockSpec((9, Cin, Cp), lambda i: (0, 0, 0))],
        out_specs=(pl.BlockSpec((tile_m, Cp), lambda i: (i, 0)),
                   pl.BlockSpec((1, _SUBLANE, Cp), lambda i: (i, 0, 0))),
        compiler_params=cparams,
    )(*ecs, *ocs, w_taps)

    # ---- tiny per-channel reduce + BN folding (wrapper-side, O(Cp)) ---------
    cnt = jnp.float32(M)                      # padded rows are zero: sums exact
    ch_sum = jnp.sum(stats[:, 0, :], axis=0)
    ch_ssq = jnp.sum(stats[:, 1, :], axis=0)
    mean = ch_sum / cnt
    var = jnp.maximum(ch_ssq / cnt - mean * mean, 0.0)   # biased, as PyTorch BN
    inv = lax.rsqrt(var + BN_EPS)
    gamma_p = jnp.pad(bn_gamma.astype(jnp.float32), (0, Cp - Cout))
    beta_p = jnp.pad(bn_beta.astype(jnp.float32), (0, Cp - Cout))
    scale = (gamma_p * inv)[None, :]                     # (1, Cp)
    shift = (beta_p - mean * gamma_p * inv)[None, :]     # (1, Cp)

    # ---- phase 2: normalize + LeakyReLU --------------------------------------
    out_flat = pl.pallas_call(
        _bn_lrelu_kernel,
        out_shape=jax.ShapeDtypeStruct((m_pad, Cp), jnp.float32),
        grid=(n_tiles,),
        in_specs=[pl.BlockSpec((tile_m, Cp), lambda i: (i, 0)),
                  pl.BlockSpec((1, Cp), lambda i: (0, 0)),
                  pl.BlockSpec((1, Cp), lambda i: (0, 0))],
        out_specs=pl.BlockSpec((tile_m, Cp), lambda i: (i, 0)),
        compiler_params=cparams,
    )(y, scale, shift)

    out = out_flat[:M, :Cout].reshape(N, Ho, Wo, Cout).astype(x_nchw.dtype)
    if out_layout == "NHWC":                  # consumers can skip the transpose
        return out
    return jnp.transpose(out, (0, 3, 1, 2))   # NCHW, matching the PyTorch module


def _reference(x_nchw, w_oihw, conv_b, bn_gamma, bn_beta):
    """Pure-JAX f32 reference for correctness checking."""
    y = lax.conv_general_dilated(
        x_nchw, w_oihw, window_strides=(2, 2), padding=((1, 1), (1, 1)),
        dimension_numbers=("NCHW", "OIHW", "NCHW"))
    y = y + conv_b[None, :, None, None]
    mean = jnp.mean(y, axis=(0, 2, 3), keepdims=True)
    var = jnp.mean((y - mean) ** 2, axis=(0, 2, 3), keepdims=True)
    y_hat = (y - mean) / jnp.sqrt(var + BN_EPS)
    z = bn_gamma[None, :, None, None] * y_hat + bn_beta[None, :, None, None]
    return jnp.where(z >= 0, z, NEG_SLOPE * z)


if __name__ == "__main__":
    N, Cin, H, W = 2, 4, 16, 16
    Cout = 8

    key = jax.random.PRNGKey(0)
    k1, k2, k3, k4, k5 = jax.random.split(key, 5)
    x = jax.random.normal(k1, (N, Cin, H, W), dtype=jnp.float32)
    w = jax.random.normal(k2, (Cout, Cin, 3, 3), dtype=jnp.float32) * 0.1
    conv_b = jax.random.normal(k3, (Cout,), dtype=jnp.float32) * 0.1
    bn_gamma = 1.0 + 0.1 * jax.random.normal(k4, (Cout,), dtype=jnp.float32)
    bn_beta = 0.1 * jax.random.normal(k5, (Cout,), dtype=jnp.float32)

    ref = _reference(x, w, conv_b, bn_gamma, bn_beta)

    # 1) f32 matmul path with a deliberately small row tile so the test
    #    exercises the multi-step grid and the ragged-edge zero padding.
    out_f32 = downsample_layer(x, w, conv_b, bn_gamma, bn_beta,
                               compute_dtype=jnp.float32, row_tile=3)
    jax.block_until_ready(out_f32)
    assert out_f32.shape == (N, Cout, H // 2, W // 2), out_f32.shape
    err_f32 = float(jnp.max(jnp.abs(out_f32 - ref)))
    assert jnp.allclose(out_f32, ref, atol=1e-3, rtol=1e-3), err_f32

    # 2) default bf16 matmul-input path (per perf guidance): f32 accumulation
    #    and f32 BN/LeakyReLU math, so only matmul inputs lose precision.
    out_bf16 = downsample_layer(x, w, conv_b, bn_gamma, bn_beta)
    jax.block_until_ready(out_bf16)
    err_bf16 = float(jnp.max(jnp.abs(out_bf16 - ref)))
    assert jnp.allclose(out_bf16, ref, atol=5e-2, rtol=5e-2), err_bf16

    print("KERNEL_OK")
</pallas_src>

<mosaic_0001>
module attributes {stable_mosaic.version = 11 : i64} {
  func.func @_bn_lrelu_kernel(%arg0: i32, %arg1: memref<24x128xf32, #tpu.memory_space<vmem>>, %arg2: memref<1x128xf32, #tpu.memory_space<vmem>>, %arg3: memref<1x128xf32, #tpu.memory_space<vmem>>, %arg4: memref<24x128xf32, #tpu.memory_space<vmem>>) attributes {dimension_semantics = [#tpu.dimension_semantics<parallel>], iteration_bounds = array<i64: 6>, scalar_prefetch = 0 : i64, scratch_operands = 0 : i64, tpu.core_type = #tpu.core_type<tc>, window_params = [{transform_indices = @transform_0, window_bounds = array<i64: 24, 128>}, {pipeline_mode = #tpu.pipeline_mode<synchronous>, transform_indices = @transform_1, window_bounds = array<i64: 1, 128>}, {pipeline_mode = #tpu.pipeline_mode<synchronous>, transform_indices = @transform_2, window_bounds = array<i64: 1, 128>}, {transform_indices = @transform_3, window_bounds = array<i64: 24, 128>}]} {
    %c0 = arith.constant 0 : index
    %c0_0 = arith.constant 0 : index
    %0 = vector.load %arg1[%c0, %c0_0] : memref<24x128xf32, #tpu.memory_space<vmem>>, vector<24x128xf32>
    %c0_1 = arith.constant 0 : index
    %c0_2 = arith.constant 0 : index
    %1 = vector.load %arg2[%c0_1, %c0_2] : memref<1x128xf32, #tpu.memory_space<vmem>>, vector<1x128xf32>
    %2 = vector.broadcast %1 : vector<1x128xf32> to vector<24x128xf32>
    %3 = arith.mulf %0, %2 : vector<24x128xf32>
    %c0_3 = arith.constant 0 : index
    %c0_4 = arith.constant 0 : index
    %4 = vector.load %arg3[%c0_3, %c0_4] : memref<1x128xf32, #tpu.memory_space<vmem>>, vector<1x128xf32>
    %5 = vector.broadcast %4 : vector<1x128xf32> to vector<24x128xf32>
    %6 = arith.addf %3, %5 : vector<24x128xf32>
    %cst = arith.constant 1.000000e-01 : f32
    %7 = vector.broadcast %cst : f32 to vector<24x128xf32>
    %8 = arith.mulf %7, %6 : vector<24x128xf32>
    %9 = arith.maximumf %6, %8 : vector<24x128xf32>
    %c0_5 = arith.constant 0 : index
    %c0_6 = arith.constant 0 : index
    %10 = vector.load %arg4[%c0_5, %c0_6] : memref<24x128xf32, #tpu.memory_space<vmem>>, vector<24x128xf32>
    tpu.vector_store %arg4[%c0_5, %c0_6], %9 {strides = array<i32>} : memref<24x128xf32, #tpu.memory_space<vmem>>, vector<24x128xf32>,
    return
  }
  func.func @transform_0(%arg0: i32) -> (i32, i32) {
    %c0_i32 = arith.constant 0 : i32
    %c0_i32_0 = arith.constant 0 : i32
    return %arg0, %c0_i32 : i32, i32
  }
  func.func @transform_1(%arg0: i32) -> (i32, i32) {
    %c0_i32 = arith.constant 0 : i32
    %c0_i32_0 = arith.constant 0 : i32
    %c0_i32_1 = arith.constant 0 : i32
    return %c0_i32, %c0_i32_0 : i32, i32
  }
  func.func @transform_2(%arg0: i32) -> (i32, i32) {
    %c0_i32 = arith.constant 0 : i32
    %c0_i32_0 = arith.constant 0 : i32
    %c0_i32_1 = arith.constant 0 : i32
    return %c0_i32, %c0_i32_0 : i32, i32
  }
  func.func @transform_3(%arg0: i32) -> (i32, i32) {
    %c0_i32 = arith.constant 0 : i32
    %c0_i32_0 = arith.constant 0 : i32
    return %arg0, %c0_i32 : i32, i32
  }
}

module attributes {stable_mosaic.version = 11 : i64} {
  func.func @_conv_stats_kernel(%arg0: i32, %arg1: memref<3x9x4xf32, #tpu.memory_space<vmem>>, %arg2: memref<3x9x4xf32, #tpu.memory_space<vmem>>, %arg3: memref<3x9x4xf32, #tpu.memory_space<vmem>>, %arg4: memref<3x8x4xf32, #tpu.memory_space<vmem>>, %arg5: memref<3x8x4xf32, #tpu.memory_space<vmem>>, %arg6: memref<3x8x4xf32, #tpu.memory_space<vmem>>, %arg7: memref<9x4x128xf32, #tpu.memory_space<vmem>>, %arg8: memref<24x128xf32, #tpu.memory_space<vmem>>, %arg9: memref<1x8x128xf32, #tpu.memory_space<vmem>>) attributes {dimension_semantics = [#tpu.dimension_semantics<parallel>], iteration_bounds = array<i64: 6>, scalar_prefetch = 0 : i64, scratch_operands = 0 : i64, tpu.core_type = #tpu.core_type<tc>, window_params = [{transform_indices = @transform_0, window_bounds = array<i64: 3, 9, 4>}, {transform_indices = @transform_1, window_bounds = array<i64: 3, 9, 4>}, {transform_indices = @transform_2, window_bounds = array<i64: 3, 9, 4>}, {transform_indices = @transform_3, window_bounds = array<i64: 3, 8, 4>}, {transform_indices = @transform_4, window_bounds = array<i64: 3, 8, 4>}, {transform_indices = @transform_5, window_bounds = array<i64: 3, 8, 4>}, {pipeline_mode = #tpu.pipeline_mode<synchronous>, transform_indices = @transform_6, window_bounds = array<i64: 9, 4, 128>}, {transform_indices = @transform_7, window_bounds = array<i64: 24, 128>}, {transform_indices = @transform_8, window_bounds = array<i64: 1, 8, 128>}]} {
    %cst = arith.constant 0.000000e+00 : f32
    %0 = vector.broadcast %cst : f32 to vector<24x128xf32>
    %c0 = arith.constant 0 : index
    %c0_0 = arith.constant 0 : index
    %c0_1 = arith.constant 0 : index
    %1 = vector.load %arg1[%c0, %c0_0, %c0_1] : memref<3x9x4xf32, #tpu.memory_space<vmem>>, vector<3x8x4xf32>
    %2 = vector.shape_cast %1 : vector<3x8x4xf32> to vector<24x4xf32>
    %c0_2 = arith.constant 0 : index
    %c0_3 = arith.constant 0 : index
    %c0_4 = arith.constant 0 : index
    %3 = vector.load %arg7[%c0_2, %c0_3, %c0_4] : memref<9x4x128xf32, #tpu.memory_space<vmem>>, vector<1x4x128xf32>
    %4 = vector.shape_cast %3 : vector<1x4x128xf32> to vector<4x128xf32>
    %cst_5 = arith.constant dense<0.000000e+00> : vector<24x128xf32>
    %5 = tpu.matmul %2, %4, %cst_5 {dimension_numbers = #tpu.dot_dimension_numbers<[1], [0], [0], [1], [0, 0, 1, 1], [], []>} : vector<24x4xf32>, vector<4x128xf32>, vector<24x128xf32> -> vector<24x128xf32>
    %6 = arith.addf %0, %5 : vector<24x128xf32>
    %c0_6 = arith.constant 0 : index
    %c0_7 = arith.constant 0 : index
    %c0_8 = arith.constant 0 : index
    %7 = vector.load %arg4[%c0_6, %c0_7, %c0_8] : memref<3x8x4xf32, #tpu.memory_space<vmem>>, vector<3x8x4xf32>
    %8 = vector.shape_cast %7 : vector<3x8x4xf32> to vector<24x4xf32>
    %c1 = arith.constant 1 : index
    %c0_9 = arith.constant 0 : index
    %c0_10 = arith.constant 0 : index
    %9 = vector.load %arg7[%c1, %c0_9, %c0_10] : memref<9x4x128xf32, #tpu.memory_space<vmem>>, vector<1x4x128xf32>
    %10 = vector.shape_cast %9 : vector<1x4x128xf32> to vector<4x128xf32>
    %cst_11 = arith.constant dense<0.000000e+00> : vector<24x128xf32>
    %11 = tpu.matmul %8, %10, %cst_11 {dimension_numbers = #tpu.dot_dimension_numbers<[1], [0], [0], [1], [0, 0, 1, 1], [], []>} : vector<24x4xf32>, vector<4x128xf32>, vector<24x128xf32> -> vector<24x128xf32>
    %12 = arith.addf %6, %11 : vector<24x128xf32>
    %c0_12 = arith.constant 0 : index
    %c1_13 = arith.constant 1 : index
    %c0_14 = arith.constant 0 : index
    %13 = vector.load %arg1[%c0_12, %c1_13, %c0_14] : memref<3x9x4xf32, #tpu.memory_space<vmem>>, vector<3x8x4xf32>
    %14 = vector.shape_cast %13 : vector<3x8x4xf32> to vector<24x4xf32>
    %c2 = arith.constant 2 : index
    %c0_15 = arith.constant 0 : index
    %c0_16 = arith.constant 0 : index
    %15 = vector.load %arg7[%c2, %c0_15, %c0_16] : memref<9x4x128xf32, #tpu.memory_space<vmem>>, vector<1x4x128xf32>
    %16 = vector.shape_cast %15 : vector<1x4x128xf32> to vector<4x128xf32>
    %cst_17 = arith.constant dense<0.000000e+00> : vector<24x128xf32>
    %17 = tpu.matmul %14, %16, %cst_17 {dimension_numbers = #tpu.dot_dimension_numbers<[1], [0], [0], [1], [0, 0, 1, 1], [], []>} : vector<24x4xf32>, vector<4x128xf32>, vector<24x128xf32> -> vector<24x128xf32>
    %18 = arith.addf %12, %17 : vector<24x128xf32>
    %c0_18 = arith.constant 0 : index
    %c0_19 = arith.constant 0 : index
    %c0_20 = arith.constant 0 : index
    %19 = vector.load %arg2[%c0_18, %c0_19, %c0_20] : memref<3x9x4xf32, #tpu.memory_space<vmem>>, vector<3x8x4xf32>
    %20 = vector.shape_cast %19 : vector<3x8x4xf32> to vector<24x4xf32>
    %c3 = arith.constant 3 : index
    %c0_21 = arith.constant 0 : index
    %c0_22 = arith.constant 0 : index
    %21 = vector.load %arg7[%c3, %c0_21, %c0_22] : memref<9x4x128xf32, #tpu.memory_space<vmem>>, vector<1x4x128xf32>
    %22 = vector.shape_cast %21 : vector<1x4x128xf32> to vector<4x128xf32>
    %cst_23 = arith.constant dense<0.000000e+00> : vector<24x128xf32>
    %23 = tpu.matmul %20, %22, %cst_23 {dimension_numbers = #tpu.dot_dimension_numbers<[1], [0], [0], [1], [0, 0, 1, 1], [], []>} : vector<24x4xf32>, vector<4x128xf32>, vector<24x128xf32> -> vector<24x128xf32>
    %24 = arith.addf %18, %23 : vector<24x128xf32>
    %c0_24 = arith.constant 0 : index
    %c0_25 = arith.constant 0 : index
    %c0_26 = arith.constant 0 : index
    %25 = vector.load %arg5[%c0_24, %c0_25, %c0_26] : memref<3x8x4xf32, #tpu.memory_space<vmem>>, vector<3x8x4xf32>
    %26 = vector.shape_cast %25 : vector<3x8x4xf32> to vector<24x4xf32>
    %c4 = arith.constant 4 : index
    %c0_27 = arith.constant 0 : index
    %c0_28 = arith.constant 0 : index
    %27 = vector.load %arg7[%c4, %c0_27, %c0_28] : memref<9x4x128xf32, #tpu.memory_space<vmem>>, vector<1x4x128xf32>
    %28 = vector.shape_cast %27 : vector<1x4x128xf32> to vector<4x128xf32>
    %cst_29 = arith.constant dense<0.000000e+00> : vector<24x128xf32>
    %29 = tpu.matmul %26, %28, %cst_29 {dimension_numbers = #tpu.dot_dimension_numbers<[1], [0], [0], [1], [0, 0, 1, 1], [], []>} : vector<24x4xf32>, vector<4x128xf32>, vector<24x128xf32> -> vector<24x128xf32>
    %30 = arith.addf %24, %29 : vector<24x128xf32>
    %c0_30 = arith.constant 0 : index
    %c1_31 = arith.constant 1 : index
    %c0_32 = arith.constant 0 : index
    %31 = vector.load %arg2[%c0_30, %c1_31, %c0_32] : memref<3x9x4xf32, #tpu.memory_space<vmem>>, vector<3x8x4xf32>
    %32 = vector.shape_cast %31 : vector<3x8x4xf32> to vector<24x4xf32>
    %c5 = arith.constant 5 : index
    %c0_33 = arith.constant 0 : index
    %c0_34 = arith.constant 0 : index
    %33 = vector.load %arg7[%c5, %c0_33, %c0_34] : memref<9x4x128xf32, #tpu.memory_space<vmem>>, vector<1x4x128xf32>
    %34 = vector.shape_cast %33 : vector<1x4x128xf32> to vector<4x128xf32>
    %cst_35 = arith.constant dense<0.000000e+00> : vector<24x128xf32>
    %35 = tpu.matmul %32, %34, %cst_35 {dimension_numbers = #tpu.dot_dimension_numbers<[1], [0], [0], [1], [0, 0, 1, 1], [], []>} : vector<24x4xf32>, vector<4x128xf32>, vector<24x128xf32> -> vector<24x128xf32>
    %36 = arith.addf %30, %35 : vector<24x128xf32>
    %c0_36 = arith.constant 0 : index
    %c0_37 = arith.constant 0 : index
    %c0_38 = arith.constant 0 : index
    %37 = vector.load %arg3[%c0_36, %c0_37, %c0_38] : memref<3x9x4xf32, #tpu.memory_space<vmem>>, vector<3x8x4xf32>
    %38 = vector.shape_cast %37 : vector<3x8x4xf32> to vector<24x4xf32>
    %c6 = arith.constant 6 : index
    %c0_39 = arith.constant 0 : index
    %c0_40 = arith.constant 0 : index
    %39 = vector.load %arg7[%c6, %c0_39, %c0_40] : memref<9x4x128xf32, #tpu.memory_space<vmem>>, vector<1x4x128xf32>
    %40 = vector.shape_cast %39 : vector<1x4x128xf32> to vector<4x128xf32>
    %cst_41 = arith.constant dense<0.000000e+00> : vector<24x128xf32>
    %41 = tpu.matmul %38, %40, %cst_41 {dimension_numbers = #tpu.dot_dimension_numbers<[1], [0], [0], [1], [0, 0, 1, 1], [], []>} : vector<24x4xf32>, vector<4x128xf32>, vector<24x128xf32> -> vector<24x128xf32>
    %42 = arith.addf %36, %41 : vector<24x128xf32>
    %c0_42 = arith.constant 0 : index
    %c0_43 = arith.constant 0 : index
    %c0_44 = arith.constant 0 : index
    %43 = vector.load %arg6[%c0_42, %c0_43, %c0_44] : memref<3x8x4xf32, #tpu.memory_space<vmem>>, vector<3x8x4xf32>
    %44 = vector.shape_cast %43 : vector<3x8x4xf32> to vector<24x4xf32>
    %c7 = arith.constant 7 : index
    %c0_45 = arith.constant 0 : index
    %c0_46 = arith.constant 0 : index
    %45 = vector.load %arg7[%c7, %c0_45, %c0_46] : memref<9x4x128xf32, #tpu.memory_space<vmem>>, vector<1x4x128xf32>
    %46 = vector.shape_cast %45 : vector<1x4x128xf32> to vector<4x128xf32>
    %cst_47 = arith.constant dense<0.000000e+00> : vector<24x128xf32>
    %47 = tpu.matmul %44, %46, %cst_47 {dimension_numbers = #tpu.dot_dimension_numbers<[1], [0], [0], [1], [0, 0, 1, 1], [], []>} : vector<24x4xf32>, vector<4x128xf32>, vector<24x128xf32> -> vector<24x128xf32>
    %48 = arith.addf %42, %47 : vector<24x128xf32>
    %c0_48 = arith.constant 0 : index
    %c1_49 = arith.constant 1 : index
    %c0_50 = arith.constant 0 : index
    %49 = vector.load %arg3[%c0_48, %c1_49, %c0_50] : memref<3x9x4xf32, #tpu.memory_space<vmem>>, vector<3x8x4xf32>
    %50 = vector.shape_cast %49 : vector<3x8x4xf32> to vector<24x4xf32>
    %c8 = arith.constant 8 : index
    %c0_51 = arith.constant 0 : index
    %c0_52 = arith.constant 0 : index
    %51 = vector.load %arg7[%c8, %c0_51, %c0_52] : memref<9x4x128xf32, #tpu.memory_space<vmem>>, vector<1x4x128xf32>
    %52 = vector.shape_cast %51 : vector<1x4x128xf32> to vector<4x128xf32>
    %cst_53 = arith.constant dense<0.000000e+00> : vector<24x128xf32>
    %53 = tpu.matmul %50, %52, %cst_53 {dimension_numbers = #tpu.dot_dimension_numbers<[1], [0], [0], [1], [0, 0, 1, 1], [], []>} : vector<24x4xf32>, vector<4x128xf32>, vector<24x128xf32> -> vector<24x128xf32>
    %54 = arith.addf %48, %53 : vector<24x128xf32>
    %c0_54 = arith.constant 0 : index
    %c0_55 = arith.constant 0 : index
    %55 = vector.load %arg8[%c0_54, %c0_55] : memref<24x128xf32, #tpu.memory_space<vmem>>, vector<24x128xf32>
    tpu.vector_store %arg8[%c0_54, %c0_55], %54 {strides = array<i32>} : memref<24x128xf32, #tpu.memory_space<vmem>>, vector<24x128xf32>,
    %cst_56 = arith.constant dense<0.000000e+00> : vector<128xf32>
    %56 = vector.multi_reduction <add>, %54, %cst_56 [0] : vector<24x128xf32> to vector<128xf32>
    %57 = arith.mulf %54, %54 : vector<24x128xf32>
    %cst_57 = arith.constant dense<0.000000e+00> : vector<128xf32>
    %58 = vector.multi_reduction <add>, %57, %cst_57 [0] : vector<24x128xf32> to vector<128xf32>
    %59 = tpu.iota {dimensions = array<i32: 1>} : vector<1x8x128xi32>
    %c0_i32 = arith.constant 0 : i32
    %60 = vector.broadcast %c0_i32 : i32 to vector<1x8x128xi32>
    %61 = arith.cmpi eq, %59, %60 : vector<1x8x128xi32>
    %62 = vector.shape_cast %56 : vector<128xf32> to vector<1x1x128xf32>
    %c1_i32 = arith.constant 1 : i32
    %63 = vector.broadcast %c1_i32 : i32 to vector<1x8x128xi32>
    %64 = arith.cmpi eq, %59, %63 : vector<1x8x128xi32>
    %65 = vector.shape_cast %58 : vector<128xf32> to vector<1x1x128xf32>
    %cst_58 = arith.constant 0.000000e+00 : f32
    %66 = vector.shape_cast %65 : vector<1x1x128xf32> to vector<1x1x128xf32>
    %67 = vector.broadcast %66 : vector<1x1x128xf32> to vector<1x8x128xf32>
    %68 = vector.broadcast %cst_58 : f32 to vector<1x8x128xf32>
    %69 = arith.select %64, %67, %68 : vector<1x8x128xi1>, vector<1x8x128xf32>
    %70 = vector.shape_cast %62 : vector<1x1x128xf32> to vector<1x1x128xf32>
    %71 = vector.broadcast %70 : vector<1x1x128xf32> to vector<1x8x128xf32>
    %72 = arith.select %61, %71, %69 : vector<1x8x128xi1>, vector<1x8x128xf32>
    %c0_59 = arith.constant 0 : index
    %c0_60 = arith.constant 0 : index
    %c0_61 = arith.constant 0 : index
    %73 = vector.load %arg9[%c0_59, %c0_60, %c0_61] : memref<1x8x128xf32, #tpu.memory_space<vmem>>, vector<1x8x128xf32>
    tpu.vector_store %arg9[%c0_59, %c0_60, %c0_61], %72 {strides = array<i32>} : memref<1x8x128xf32, #tpu.memory_space<vmem>>, vector<1x8x128xf32>,
    return
  }
  func.func @transform_0(%arg0: i32) -> (i32, i32, i32) {
    %c0_i32 = arith.constant 0 : i32
    %c0_i32_0 = arith.constant 0 : i32
    %c0_i32_1 = arith.constant 0 : i32
    return %arg0, %c0_i32, %c0_i32_0 : i32, i32, i32
  }
  func.func @transform_1(%arg0: i32) -> (i32, i32, i32) {
    %c0_i32 = arith.constant 0 : i32
    %c0_i32_0 = arith.constant 0 : i32
    %c0_i32_1 = arith.constant 0 : i32
    return %arg0, %c0_i32, %c0_i32_0 : i32, i32, i32
  }
  func.func @transform_2(%arg0: i32) -> (i32, i32, i32) {
    %c0_i32 = arith.constant 0 : i32
    %c0_i32_0 = arith.constant 0 : i32
    %c0_i32_1 = arith.constant 0 : i32
    return %arg0, %c0_i32, %c0_i32_0 : i32, i32, i32
  }
  func.func @transform_3(%arg0: i32) -> (i32, i32, i32) {
    %c0_i32 = arith.constant 0 : i32
    %c0_i32_0 = arith.constant 0 : i32
    %c0_i32_1 = arith.constant 0 : i32
    return %arg0, %c0_i32, %c0_i32_0 : i32, i32, i32
  }
  func.func @transform_4(%arg0: i32) -> (i32, i32, i32) {
    %c0_i32 = arith.constant 0 : i32
    %c0_i32_0 = arith.constant 0 : i32
    %c0_i32_1 = arith.constant 0 : i32
    return %arg0, %c0_i32, %c0_i32_0 : i32, i32, i32
  }
  func.func @transform_5(%arg0: i32) -> (i32, i32, i32) {
    %c0_i32 = arith.constant 0 : i32
    %c0_i32_0 = arith.constant 0 : i32
    %c0_i32_1 = arith.constant 0 : i32
    return %arg0, %c0_i32, %c0_i32_0 : i32, i32, i32
  }
  func.func @transform_6(%arg0: i32) -> (i32, i32, i32) {
    %c0_i32 = arith.constant 0 : i32
    %c0_i32_0 = arith.constant 0 : i32
    %c0_i32_1 = arith.constant 0 : i32
    %c0_i32_2 = arith.constant 0 : i32
    return %c0_i32, %c0_i32_0, %c0_i32_1 : i32, i32, i32
  }
  func.func @transform_7(%arg0: i32) -> (i32, i32) {
    %c0_i32 = arith.constant 0 : i32
    %c0_i32_0 = arith.constant 0 : i32
    return %arg0, %c0_i32 : i32, i32
  }
  func.func @transform_8(%arg0: i32) -> (i32, i32, i32) {
    %c0_i32 = arith.constant 0 : i32
    %c0_i32_0 = arith.constant 0 : i32
    %c0_i32_1 = arith.constant 0 : i32
    return %arg0, %c0_i32, %c0_i32_0 : i32, i32, i32
  }
}

</mosaic_0001>

<bundles_post_ra>
// kernel: downsample_layer.3
= control target key start
LH: loop header
LB: loop body
LE: loop exit
PB: predicated region body
PF: predicated region fallthrough
CT: control target
= control target key end

     0   :  { %s309_s12 = smov 0   ;;  %s332_s0 = inlined_call_operand.vmem [shape: f32[144,128], index: 0, kind: input, shape index: {}]   ;;  %s333_s1 = inlined_call_operand.vmem [shape: f32[1,128], index: 1, kind: input, shape index: {}]   ;;  %s334_s2 = inlined_call_operand.vmem [shape: f32[1,128], index: 2, kind: input, shape index: {}]   ;;  %s335_s3 = inlined_call_operand.vmem [shape: f32[144,128], index: 3, kind: output, shape index: {}]  }
   0x1 LB: > { %s262_s13 = sadd.s32 4294967295, %s287_s12   ;;  %p266_p0 = scmp.ge.s32.totalorder %s287_s12, 1  ;;  %s287_s12 = sphi %s309_s12, %s13_s12  }
   0x2   : > { %p138_p1 = scmp.lt.s32.totalorder %s287_s12, 7 }
   0x4   : > { %p139_p2 = pnand %p266_p0, %p138_p1 }
   0x5   : > { %s162_s14 = smul.u32 (!%p139_p2), 3, %s262_s13  ;;  %v269_v0 = vld [vmem:[%s333_s1] ss:$0 sm:$0xff] (!%p139_p2) }
   0x6   : > { %142 = sbr.rel (%p139_p2) target bundleno = 27 (0x1b), region = 32  ;;  %v270_v1 = vld [vmem:[%s334_s2] ss:$0 sm:$0xff] (!%p139_p2) }
   0x7   : > { %p163_p3 = scmp.lt.s32.totalorder (!%p139_p2), %s162_s14, 17 }
   0xd   : > { %s337_s14 = smov (!%p163_p3, %s162_s14), 17 }
   0xe   : > { %s267_s15 = sshll.u32 %s337_s14, 3 }
   0xf   : > { %s166_s20 = scalar_lea.vmem %s332_s0, %s267_s15  ;;  %s172_s25 = scalar_lea.vmem %s335_s3, %s267_s15 }
  0x10   : > { %v174_v2 = vld [vmem:[%s166_s20] sm:$0xff]  ;;  %v175_v3 = vld [vmem:[%s166_s20 + $0x8] sm:$0xff]  ;;  %v176_v4 = vld [vmem:[%s166_s20 + $0x10] sm:$0xff] }
  0x11   : > { %v184_v5 = vmul.f32 %v269_v0, %v174_v2  ;;  %v185_v6 = vmul.f32 %v269_v0, %v175_v3  ;;  %v186_v7 = vmul.f32 %v269_v0, %v176_v4 }
  0x13   : > { %v194_v8 = vadd.f32 %v270_v1, %v184_v5  ;;  %v195_v9 = vadd.f32 %v270_v1, %v185_v6  ;;  %v196_v10 = vadd.f32 %v270_v1, %v186_v7 }
  0x15   : > { %v197_v11 = vmul.f32 0.1, %v194_v8  ;;  %v198_v12 = vmul.f32 0.1, %v195_v9  ;;  %v199_v13 = vmul.f32 0.1, %v196_v10 }
  0x17   : > { %v200_v14 = vmax.f32 %v194_v8, %v197_v11  ;;  %v201_v15 = vmax.f32 %v195_v9, %v198_v12  ;;  %v202_v16 = vmax.f32 %v196_v10, %v199_v13 }
  0x19   : > { %203 = vst [vmem:[%s172_s25] sm:$0xff] %v200_v14  ;;  %204 = vst [vmem:[%s172_s25 + $0x8] sm:$0xff] %v201_v15 }
  0x1a   : > { %205 = vst [vmem:[%s172_s25 + $0x10] sm:$0xff] %v202_v16 }
  0x1b PF: > { %s13_s12 = sadd.s32 1, %s287_s12  }
  0x1c   : > { %p10_p4 = scmp.ge.s32.totalorder %s13_s12, 8  }
  0x1e   :  { %12 = sbr.rel (!%p10_p4) target bundleno = 1 (0x1), region = 62 }

// kernel: downsample_layer.2
= control target key start
LH: loop header
LB: loop body
LE: loop exit
PB: predicated region body
PF: predicated region fallthrough
CT: control target
= control target key end

     0   :  { %s1822_s27 = smov 0   ;;  %s2034_s0 = inlined_call_operand.vmem [shape: f32[18,9,4], index: 0, kind: input, shape index: {}]   ;;  %s2035_s1 = inlined_call_operand.vmem [shape: f32[18,9,4], index: 1, kind: input, shape index: {}]   ;;  %s2036_s2 = inlined_call_operand.vmem [shape: f32[18,9,4], index: 2, kind: input, shape index: {}]   ;;  %s2037_s3 = inlined_call_operand.vmem [shape: f32[18,8,4], index: 3, kind: input, shape index: {}]   ;;  %s2038_s4 = inlined_call_operand.vmem [shape: f32[18,8,4], index: 4, kind: input, shape index: {}]   ;;  %s2039_s5 = inlined_call_operand.vmem [shape: f32[18,8,4], index: 5, kind: input, shape index: {}]   ;;  %s2040_s6 = inlined_call_operand.vmem [shape: f32[9,4,128], index: 6, kind: input, shape index: {}]   ;;  %s2041_s7 = inlined_call_operand.vmem [shape: f32[144,128], index: 7, kind: output, shape index: {0}]   ;;  %s2042_s8 = inlined_call_operand.vmem [shape: f32[6,8,128], index: 8, kind: output, shape index: {1}]  }
   0x1 LB: > { %s1828_s28 = sadd.s32 4294967295, %s1773_s27   ;;  %p1514_p0 = scmp.ge.s32.totalorder %s1773_s27, 1  ;;  %s1773_s27 = sphi %s1822_s27, %s19_s27  }
   0x2   : > { %p324_p1 = scmp.lt.s32.totalorder %s1773_s27, 7 }
   0x4   : > { %p325_p2 = pnand %p1514_p0, %p324_p1 }
   0x5   : > { %v1526_v0 = vld [vmem:[%s2040_s6 + $0x4] sm:$0xf] (!%p325_p2)  ;;  %vm458_vm0 = vcmask (!%p325_p2), 1043456   ;;  %v1838_v1 = vld [vmem:[%s2040_s6 + $0x10] sm:$0xf] (!%p325_p2)  ;;  %v1775_v2 = vmov (!%p325_p2), 0.0   ;;  %v1356_v62 = vlaneseq (!%p325_p2) }
   0x6   : > { %328 = sbr.rel (%p325_p2) target bundleno = 303 (0x12f), region = 48  ;;  %1611 = vmatprep.subr.mxu1 (!%p325_p2), %v1775_v2  ;;  %1655 = vmatprep.subr.mxu0 (!%p325_p2), %v1775_v2  ;;  %vm1776_vm1 = vmmov (!%p325_p2), 0   ;;  %vm448_vm2 = vcmask (!%p325_p2), 31744   ;;  %v442_v3 = vld [vmem:[%s2040_s6] sm:$0xf] (!%p325_p2)  ;;  %p435_p4 = scmp.lt.s32.totalorder (!%p325_p2), %s1828_s28, 5 }
   0x7   : > { %s390_s11 = smul.u32 (!%p325_p2), 3, %s1828_s28  ;;  %1612 = vmatpush3.msk.msra.mxu1 (!%p325_p2), %vm458_vm0, %v1526_v0  ;;  %1656 = vmatpush3.msk.msra.mxu0 (!%p325_p2), %vm458_vm0, %v1838_v1  ;;  %v1550_v4 = vld [vmem:[%s2040_s6 + $0x14] sm:$0xf] (!%p325_p2)  ;;  %v1555_v10 = vld [vmem:[%s2040_s6 + $0x18] sm:$0xf] (!%p325_p2) }
   0x8   : > { %1613 = vmatprep.mubr.msk.f32.mxu1 (!%p325_p2), %vm1776_vm1, %v1775_v2  ;;  %1622 = vmatprep.subr.mxu1 (!%p325_p2), %v1775_v2  ;;  %v1535_v13 = vld [vmem:[%s2040_s6 + $0x8] sm:$0xf] (!%p325_p2)  ;;  %v1560_v18 = vld [vmem:[%s2040_s6 + $0x1c] sm:$0xf] (!%p325_p2)  ;;  %v1540_v21 = vld [vmem:[%s2040_s6 + $0xc] sm:$0xf] (!%p325_p2) }
   0x9   : > { %p391_p3 = scmp.lt.s32.totalorder (!%p325_p2), %s390_s11, 17  ;;  %1657 = vmatprep.mubr.msk.f32.mxu0 (!%p325_p2), %vm1776_vm1, %v1775_v2  ;;  %1666 = vmatprep.subr.mxu0 (!%p325_p2), %v1775_v2  ;;  %v1565_v26 = vld [vmem:[%s2040_s6 + $0x20] sm:$0xf] (!%p325_p2) }
   0xd   : > { %s2044_s11 = smov (!%p391_p3, %s390_s11), 17  ;;  %s2046_s28 = smov (!%p435_p4, %s1828_s28), 5 }
   0xe   : > { %s1852_s12 = sshll.u32 %s2044_s11, 3  ;;  %s1870_s23 = sshll.u32 %s2044_s11, 4 }
   0xf   : > { %s415_s15 = scalar_lea.vmem %s2037_s3, %s1852_s12  ;;  %s1865_s20 = scalar_lea.vmem %s2038_s4, %s1852_s12 }
  0x10   : > { %v443_v5 = vld [vmem:[%s415_s15] sm:$0xff]  ;;  %v444_v7 = vld [vmem:[%s415_s15 + $0x8] sm:$0xff]  ;;  %s1885_s26 = scalar_lea.vmem %s2035_s1, %s1870_s23  ;;  %v445_v8 = vld [vmem:[%s415_s15 + $0x10] sm:$0xff]  ;;  %s1897_s9 = scalar_lea.vmem %s2034_s0, %s1870_s23 }
  0x11   : > { %v834_v6 = vld [vmem:[%s1865_s20] sm:$0xff]  ;;  %1614 = vmatmul.mubr.msk.f32.vlgmr.msra.gmra.mrb[0].mxu1 %vm448_vm2, %v443_v5  ;;  %v935_v12 = vld [vmem:[%s1885_s26 + $0x11] sm:$0xff]  ;;  %s1926_s17 = scalar_lea.vmem %s2036_s2, %s1870_s23  ;;  %s427_s25 = scalar_lea.vmem %s2039_s5, %s1852_s12  ;;  %v835_v33 = vld [vmem:[%s1865_s20 + $0x8] sm:$0xff] }
  0x12   : > { %1658 = vmatmul.mubr.msk.f32.vlgmr.msra.gmra.mrb[0].mxu0 %vm448_vm2, %v834_v6  ;;  %1623 = vmatpush3.msk.msra.mxu1 %vm458_vm0, %v442_v3  ;;  %v934_v9 = vld [vmem:[%s1885_s26 + $0x1] sm:$0xff]  ;;  %v440_v14 = vld [vmem:[%s1897_s9 + $0x10] sm:$0xff]  ;;  %s433_s10 = scalar_lea.vmem %s2041_s7, %s1852_s12  ;;  %v1357_v3 = vshrl.u32 %v1356_v62, 7  ;;  %s1525_s12 = sshll.u32 %s2046_s28, 3 }
  0x13   : > { %1667 = vmatpush3.msk.msra.mxu0 %vm458_vm0, %v1550_v4  ;;  %1616 = vmatprep.mubr.msk.f32.mxu1 %vm1776_vm1, %v1775_v2  ;;  %v439_v11 = vld [vmem:[%s1897_s9] sm:$0xff]  ;;  %v1035_v20 = vld [vmem:[%s1926_s17 + $0x10] sm:$0xff]  ;;  %v1135_v28 = vld [vmem:[%s427_s25 + $0x8] sm:$0xff]  ;;  %s438_s13 = scalar_lea.vmem %s2042_s8, %s1525_s12 }
  0x14   : > { %1668 = vmatprep.mubr.msk.f32.mxu0 %vm1776_vm1, %v1775_v2  ;;  %1677 = vmatprep.subr.mxu0 %v1775_v2  ;;  %v936_v15 = vld [vmem:[%s1885_s26 + $0x21] sm:$0xff]  ;;  %v635_v22 = vld [vmem:[%s1897_s9 + $0x11] sm:$0xff]  ;;  %vm1359_vm3 = vcmp.eq.s32.totalorder %v1357_v3, 1  ;;  %vm1358_vm4 = vcmp.eq.s32.totalorder %v1357_v3, 0 }
  0x15   : > { %1633 = vmatprep.subr.mxu1 %v1775_v2  ;;  %1617 = vmatmul.mubr.msk.f32.gmra.mrb[2].mxu1 %vm448_vm2, %v444_v7  ;;  %v441_v16 = vld [vmem:[%s1897_s9 + $0x20] sm:$0xff]  ;;  %v735_v29 = vld [vmem:[%s1885_s26 + $0x10] sm:$0xff] }
  0x16   : > { %1619 = vmatprep.mubr.msk.f32.mxu1 %vm1776_vm1, %v1775_v2  ;;  %v1034_v17 = vld [vmem:[%s1926_s17] sm:$0xff]  ;;  %v1136_v30 = vld [vmem:[%s427_s25 + $0x10] sm:$0xff] }
  0x17   : > { %v634_v19 = vld [vmem:[%s1897_s9 + $0x1] sm:$0xff]  ;;  %v1235_v34 = vld [vmem:[%s1926_s17 + $0x11] sm:$0xff] }
  0x18   : > { %v1036_v23 = vld [vmem:[%s1926_s17 + $0x20] sm:$0xff]  ;;  %v836_v35 = vld [vmem:[%s1865_s20 + $0x10] sm:$0xff] }
  0x19   : > { %1620 = vmatmul.mubr.msk.f32.gmra.mrb[4].mxu1 %vm448_vm2, %v445_v8  ;;  %v636_v24 = vld [vmem:[%s1897_s9 + $0x21] sm:$0xff] }
  0x1a   : > { %1669 = vmatmul.mubr.msk.f32.vlgmr.msra.gmra.mrb[0].mxu0 %vm448_vm2, %v934_v9  ;;  %1624 = vmatprep.mubr.msk.f32.mxu1 %vm1776_vm1, %v1775_v2  ;;  %v1134_v25 = vld [vmem:[%s427_s25] sm:$0xff] }
  0x1b   : > { %1678 = vmatpush3.msk.msra.mxu0 %vm458_vm0, %v1555_v10  ;;  %1671 = vmatprep.mubr.msk.f32.mxu0 %vm1776_vm1, %v1775_v2  ;;  %v734_v27 = vld [vmem:[%s1885_s26] sm:$0xff] }
  0x1c   : > { %1688 = vmatprep.subr.mxu0 %v1775_v2  ;;  %v736_v31 = vld [vmem:[%s1885_s26 + $0x20] sm:$0xff] }
  0x1d   : > { %1625 = vmatmul.mubr.msk.f32.vlgmr.msra.gmra.mrb[0].mxu1 %vm448_vm2, %v439_v11  ;;  %v1234_v32 = vld [vmem:[%s1926_s17 + $0x1] sm:$0xff] }
  0x1e   : > { %1672 = vmatmul.mubr.msk.f32.gmra.mrb[2].mxu0 %vm448_vm2, %v935_v12  ;;  %1634 = vmatpush3.msk.msra.mxu1 %vm458_vm0, %v1535_v13  ;;  %v1236_v36 = vld [vmem:[%s1926_s17 + $0x21] sm:$0xff] }
  0x1f   : > { %1627 = vmatprep.mubr.msk.f32.mxu1 %vm1776_vm1, %v1775_v2  ;;  %1674 = vmatprep.mubr.msk.f32.mxu0 %vm1776_vm1, %v1775_v2 }
  0x20   : > { %1644 = vmatprep.subr.mxu1 %v1775_v2 }
  0x21   : > { %1628 = vmatmul.mubr.msk.f32.gmra.mrb[2].mxu1 %vm448_vm2, %v440_v14 }
  0x22   : > { %1675 = vmatmul.mubr.msk.f32.gmra.mrb[4].mxu0 %vm448_vm2, %v936_v15  ;;  %1630 = vmatprep.mubr.msk.f32.mxu1 %vm1776_vm1, %v1775_v2 }
  0x23   : > { %1679 = vmatprep.mubr.msk.f32.mxu0 %vm1776_vm1, %v1775_v2 }
  0x25   : > { %1631 = vmatmul.mubr.msk.f32.gmra.mrb[4].mxu1 %vm448_vm2, %v441_v16 }
  0x26   : > { %1680 = vmatmul.mubr.msk.f32.vlgmr.msra.gmra.mrb[0].mxu0 %vm448_vm2, %v1034_v17  ;;  %1635 = vmatprep.mubr.msk.f32.mxu1 %vm1776_vm1, %v1775_v2 }
  0x27   : > { %1689 = vmatpush3.msk.msra.mxu0 %vm458_vm0, %v1560_v18  ;;  %1682 = vmatprep.mubr.msk.f32.mxu0 %vm1776_vm1, %v1775_v2 }
  0x28   : > { %1699 = vmatprep.subr.mxu0 %v1775_v2 }
  0x29   : > { %1636 = vmatmul.mubr.msk.f32.vlgmr.msra.gmra.mrb[0].mxu1 %vm448_vm2, %v634_v19 }
  0x2a   : > { %1683 = vmatmul.mubr.msk.f32.gmra.mrb[2].mxu0 %vm448_vm2, %v1035_v20  ;;  %1645 = vmatpush3.msk.msra.mxu1 %vm458_vm0, %v1540_v21 }
  0x2b   : > { %1638 = vmatprep.mubr.msk.f32.mxu1 %vm1776_vm1, %v1775_v2  ;;  %1685 = vmatprep.mubr.msk.f32.mxu0 %vm1776_vm1, %v1775_v2 }
  0x2c   : > { %1710 = vmatprep.subr.mxu1 %v1775_v2 }
  0x2d   : > { %1639 = vmatmul.mubr.msk.f32.gmra.mrb[2].mxu1 %vm448_vm2, %v635_v22 }
  0x2e   : > { %1686 = vmatmul.mubr.msk.f32.gmra.mrb[4].mxu0 %vm448_vm2, %v1036_v23  ;;  %1641 = vmatprep.mubr.msk.f32.mxu1 %vm1776_vm1, %v1775_v2 }
  0x2f   : > { %1690 = vmatprep.mubr.msk.f32.mxu0 %vm1776_vm1, %v1775_v2 }
  0x31   : > { %1642 = vmatmul.mubr.msk.f32.gmra.mrb[4].mxu1 %vm448_vm2, %v636_v24 }
  0x32   : > { %1691 = vmatmul.mubr.msk.f32.vlgmr.msra.gmra.mrb[0].mxu0 %vm448_vm2, %v1134_v25  ;;  %1646 = vmatprep.mubr.msk.f32.mxu1 %vm1776_vm1, %v1775_v2 }
  0x33   : > { %1700 = vmatpush3.msk.msra.mxu0 %vm458_vm0, %v1565_v26  ;;  %1693 = vmatprep.mubr.msk.f32.mxu0 %vm1776_vm1, %v1775_v2 }
  0x35   : > { %1647 = vmatmul.mubr.msk.f32.vlgmr.msra.gmra.mrb[0].mxu1 %vm448_vm2, %v734_v27 }
  0x36   : > { %1694 = vmatmul.mubr.msk.f32.gmra.mrb[2].mxu0 %vm448_vm2, %v1135_v28  ;;  %1711 = vmatpush3.msk.msra.mxu1 %vm458_vm0, %v1838_v1 }
  0x37   : > { %1649 = vmatprep.mubr.msk.f32.mxu1 %vm1776_vm1, %v1775_v2  ;;  %1696 = vmatprep.mubr.msk.f32.mxu0 %vm1776_vm1, %v1775_v2 }
  0x39   : > { %1650 = vmatmul.mubr.msk.f32.gmra.mrb[2].mxu1 %vm448_vm2, %v735_v29 }
  0x3a   : > { %1697 = vmatmul.mubr.msk.f32.gmra.mrb[4].mxu0 %vm448_vm2, %v1136_v30  ;;  %1652 = vmatprep.mubr.msk.f32.mxu1 %vm1776_vm1, %v1775_v2 }
  0x3b   : > { %1701 = vmatprep.mubr.msk.f32.mxu0 %vm1776_vm1, %v1775_v2 }
  0x3d   : > { %1653 = vmatmul.mubr.msk.f32.gmra.mrb[4].mxu1 %vm448_vm2, %v736_v31 }
  0x3e   : > { %1702 = vmatmul.mubr.msk.f32.vlgmr.msra.gmra.mrb[0].mxu0 %vm448_vm2, %v1234_v32  ;;  %1660 = vmatprep.mubr.msk.f32.mxu1 %vm1776_vm1, %v1775_v2 }
  0x3f   : > { %1704 = vmatprep.mubr.msk.f32.mxu0 %vm1776_vm1, %v1775_v2 }
  0x41   : > { %1661 = vmatmul.mubr.msk.f32.vlgmr.msra.gmra.mrb[2].mxu1 %vm448_vm2, %v835_v33 }
  0x42   : > { %1705 = vmatmul.mubr.msk.f32.gmra.mrb[2].mxu0 %vm448_vm2, %v1235_v34  ;;  %1663 = vmatprep.mubr.msk.f32.mxu1 %vm1776_vm1, %v1775_v2 }
  0x43   : > { %1707 = vmatprep.mubr.msk.f32.mxu0 %vm1776_vm1, %v1775_v2 }
  0x45   : > { %1664 = vmatmul.mubr.msk.f32.gmra.mrb[4].mxu1 %vm448_vm2, %v836_v35 }
  0x46   : > { %1708 = vmatmul.mubr.msk.f32.gmra.mrb[4].mxu0 %vm448_vm2, %v1236_v36 }
 0x108   : > { %v817_v37 = vpop.f32.mrb[0].mxu1 }
 0x109   : > { %v1648_v38 = vpop.f32.mrb[1].mxu1 }
 0x111   : > { %v1317_v39 = vpop.f32.mrb[0].mxu0 }
 0x112   : > { %v1712_v40 = vadd.f32 %v1317_v39, %v817_v37  ;;  %v1703_v41 = vpop.f32.mrb[1].mxu0 }
 0x114   : > { %1334 = vst [vmem:[%s433_s10] sm:$0xff] %v1712_v40  ;;  %v922_v42 = vpop.f32.mrb[2].mxu1  ;;  %v1345_v47 = vmul.f32 %v1712_v40, %v1712_v40 }
 0x115   : > { %v1322_v43 = vpop.f32.mrb[2].mxu0  ;;  %v1662_v45 = vpop.f32.mrb[3].mxu1 }
 0x116   : > { %v1713_v44 = vadd.f32 %v1322_v43, %v922_v42  ;;  %v1706_v46 = vpop.f32.mrb[3].mxu0 }
 0x118   : > { %1335 = vst [vmem:[%s433_s10 + $0x8] sm:$0xff] %v1713_v44  ;;  %v1337_v48 = vadd.f32 %v1713_v44, %v1712_v40  ;;  %v1346_v49 = vmul.f32 %v1713_v44, %v1713_v44  ;;  %v927_v50 = vpop.f32.mrb[4].mxu1 }
 0x119   : > { %v1327_v51 = vpop.f32.mrb[4].mxu0  ;;  %v1665_v54 = vpop.f32.mrb[5].mxu1 }
 0x11a   : > { %v1348_v52 = vadd.f32 %v1346_v49, %v1345_v47  ;;  %v1714_v53 = vadd.f32 %v1327_v51, %v927_v50  ;;  %v1709_v55 = vpop.f32.mrb[5].mxu0 }
 0x11c   : > { %1336 = vst [vmem:[%s433_s10 + $0x10] sm:$0xff] %v1714_v53  ;;  %v1338_v56 = vadd.f32 %v1714_v53, %v1337_v48  ;;  %v1347_v57 = vmul.f32 %v1714_v53, %v1714_v53 }
 0x11e   : > { %v1339_v58 = vrot.slane %v1338_v56, 4  ;;  %v1349_v59 = vadd.f32 %v1348_v52, %v1347_v57 }
 0x120   : > { %v1340_v60 = vadd.f32 %v1339_v58, %v1338_v56  ;;  %v1350_v61 = vrot.slane %v1349_v59, 4 }
 0x122   : > { %v1341_v63 = vrot.slane %v1340_v60, 2  ;;  %v1351_v0 = vadd.f32 %v1350_v61, %v1349_v59 }
 0x124   : > { %v1342_v1 = vadd.f32 %v1341_v63, %v1340_v60  ;;  %v1352_v2 = vrot.slane %v1351_v0, 2 }
 0x126   : > { %v1353_v4 = vadd.f32 %v1352_v2, %v1351_v0  ;;  %v1343_v5 = vrot.slane %v1342_v1, 1 }
 0x128   : > { %v1354_v6 = vrot.slane %v1353_v4, 1  ;;  %v1344_v8 = vadd.f32 %v1343_v5, %v1342_v1 }
 0x12a   : > { %v1355_v7 = vadd.f32 %v1354_v6, %v1353_v4 }
 0x12c   : > { %v1360_v9 = vsel %vm1359_vm3, %v1355_v7, 0.0 }
 0x12d   : > { %v1361_v10 = vsel %vm1358_vm4, %v1344_v8, %v1360_v9 }
 0x12e   : > { %1362 = vst [vmem:[%s438_s13] sm:$0xff] %v1361_v10 }
 0x12f PF: > { %s19_s27 = sadd.s32 1, %s1773_s27  }
 0x130   : > { %p16_p5 = scmp.ge.s32.totalorder %s19_s27, 8  }
 0x132   :  { %18 = sbr.rel (!%p16_p5) target bundleno = 1 (0x1), region = 113 }

</bundles_post_ra>
